<compile_context>
chip_gen: v7x
topology: tpu7x:2x2x1
jax: 0.10.0
libtpu: 0.0.40
codegen_flags: <defaults>
</compile_context>

<pallas_src>
import functools

import jax
import jax.numpy as jnp
from jax.experimental import pallas as pl
from jax.experimental.pallas import tpu as pltpu

HEAD_ROWS = 8     # 3 actor logits + 1 critic value + 4 zero rows (sublane-dense)
HIDDEN_PAD = 128  # fc1 hidden (64) zero-padded to a full lane group / MXU K
LANE = 128


def actor_critic_kernel(xT_ref, w1T_ref, b1T_ref, whT_ref, bhT_ref, outT_ref):
    """All operands transposed: batch lives on the lane (last) axis.

    xT : (num_inputs, tb)                             streamed
    w1T: (HIDDEN_PAD, num_inputs), b1T: (HIDDEN_PAD, 1)   resident weights
    whT: (HEAD_ROWS, HIDDEN_PAD),  bhT: (HEAD_ROWS, 1)    resident fused head
    out: (HEAD_ROWS, tb)  rows 0:3 = logits^T, row 3 = value^T, rows 4:8 = 0
    """
    x = xT_ref[...]                              # (num_inputs, tb)
    num_inputs = x.shape[0]

    # fc1 + relu on the VPU: K = num_inputs = 2 -> two FMAs (no MXU padding).
    hT = b1T_ref[...]                            # (HIDDEN_PAD, 1)
    for k in range(num_inputs):                  # static unroll
        hT = hT + w1T_ref[:, k:k + 1] * x[k:k + 1, :]   # (H,1)*(1,tb) -> (H,tb)
    hT = jnp.maximum(hT, 0.0)                    # (HIDDEN_PAD, tb)

    # Fused actor+critic head: one MXU matmul, (8, tb) lane-dense output.
    outT = jnp.dot(whT_ref[...], hT, preferred_element_type=jnp.float32)
    outT_ref[...] = outT + bhT_ref[...]
    # TODO(synk): when used from act(), fuse log-softmax / categorical sampling
    # (pltpu.prng_*) here as an epilogue -- the EUP slot is idle and it would
    # save a second dispatch plus an HBM roundtrip of the logits.


def prepare_params(params, n_actions=3):
    """Pack raw (w1, b1, wa, ba, wc, bc) into transposed, padded kernel operands.

    Call ONCE per parameter update (outside the rollout loop): this is pure XLA
    pad/scatter work that must not be re-done every forward call.
    """
    w1, b1, wa, ba, wc, bc = params
    num_inputs, hidden = w1.shape
    assert n_actions + 1 <= HEAD_ROWS and hidden <= HIDDEN_PAD

    # fc1, transposed + hidden zero-padded to HIDDEN_PAD (relu(0)=0 rows are
    # harmless and the head columns for them are zero anyway).
    w1T = jnp.zeros((HIDDEN_PAD, num_inputs), jnp.float32).at[:hidden, :].set(w1.T)
    b1T = jnp.zeros((HIDDEN_PAD, 1), jnp.float32).at[:hidden, 0].set(b1)

    # Fused actor+critic head as an (8, HIDDEN_PAD) LHS; critic bias folded in.
    whT = jnp.zeros((HEAD_ROWS, HIDDEN_PAD), jnp.float32)
    whT = whT.at[:n_actions, :hidden].set(wa.T)
    whT = whT.at[n_actions, :hidden].set(wc[:, 0])
    bhT = jnp.zeros((HEAD_ROWS, 1), jnp.float32)
    bhT = bhT.at[:n_actions, 0].set(ba)
    bhT = bhT.at[n_actions, 0].set(bc[0])
    return w1T, b1T, whT, bhT


@functools.partial(jax.jit, static_argnames=("n_actions", "batch_tile"))
def actor_critic_forward(state, w1T, b1T, whT, bhT, *, n_actions=3,
                         batch_tile=None):
    """state: (B, num_inputs) f32 -> (logits (B, n_actions), value (B, 1)).

    batch_tile:
      * None (default): single grid step -- best on v5e/v6e (one TensorCore,
        grid steps are a serial loop with ~0.35 us/step pure overhead).
      * B // 2 on v7x: grid=(2,) with the "parallel" semantic maps one step per
        TensorCore.  Must be a multiple of 128 and divide B.
    VMEM is never a concern here (weights ~66 KiB, tiles are tiny), so no
    vmem_limit_bytes override is needed on any generation.
    """
    B, num_inputs = state.shape

    if batch_tile is None or batch_tile >= B:
        tb = B                       # single grid step
    else:
        if B % batch_tile != 0 or batch_tile % LANE != 0:
            raise ValueError("batch_tile must divide B and be a multiple of 128")
        tb = batch_tile
    grid = (B // tb,)

    outT = pl.pallas_call(
        actor_critic_kernel,
        grid=grid,
        in_specs=[
            pl.BlockSpec((num_inputs, tb), lambda i: (0, i)),           # state
            pl.BlockSpec((HIDDEN_PAD, num_inputs), lambda i: (0, 0)),   # w1T resident
            pl.BlockSpec((HIDDEN_PAD, 1), lambda i: (0, 0)),            # b1T resident
            pl.BlockSpec((HEAD_ROWS, HIDDEN_PAD), lambda i: (0, 0)),    # whT resident
            pl.BlockSpec((HEAD_ROWS, 1), lambda i: (0, 0)),             # bhT resident
        ],
        out_specs=pl.BlockSpec((HEAD_ROWS, tb), lambda i: (0, i)),
        out_shape=jax.ShapeDtypeStruct((HEAD_ROWS, B), jnp.float32),
        compiler_params=pltpu.CompilerParams(
            dimension_semantics=("parallel",)),   # v7x: shard steps over 2 TCs
    )(state.T, w1T, b1T, whT, bhT)

    logits = outT[:n_actions, :].T                    # (B, n_actions)
    value = outT[n_actions:n_actions + 1, :].T        # (B, 1)
    return logits, value


def xavier_uniform(key, shape):
    # PyTorch xavier_uniform_ : bound = sqrt(6 / (fan_in + fan_out)).
    fan_in, fan_out = shape
    bound = (6.0 / (fan_in + fan_out)) ** 0.5
    return jax.random.uniform(key, shape, jnp.float32, -bound, bound)


def init_params(key, num_inputs=2, hidden=64, n_actions=3):
    k1, k2, k3, kb1, kb2, kb3 = jax.random.split(key, 6)
    # Weights stored (in, out) (PyTorch Linear applies y = x @ W.T + b).
    w1 = xavier_uniform(k1, (num_inputs, hidden))
    wa = xavier_uniform(k2, (hidden, n_actions))
    wc = xavier_uniform(k3, (hidden, 1))
    # PyTorch default bias init: U(-1/sqrt(fan_in), 1/sqrt(fan_in)).
    b1 = jax.random.uniform(kb1, (hidden,), jnp.float32,
                            -1.0 / num_inputs ** 0.5, 1.0 / num_inputs ** 0.5)
    ba = jax.random.uniform(kb2, (n_actions,), jnp.float32,
                            -1.0 / hidden ** 0.5, 1.0 / hidden ** 0.5)
    bc = jax.random.uniform(kb3, (1,), jnp.float32,
                            -1.0 / hidden ** 0.5, 1.0 / hidden ** 0.5)
    return (w1, b1, wa, ba, wc, bc)


def reference_forward(state, params):
    w1, b1, wa, ba, wc, bc = params
    h = jnp.maximum(state @ w1 + b1, 0.0)
    return h @ wa + ba, h @ wc + bc


if __name__ == "__main__":
    key = jax.random.PRNGKey(0)
    kp, kx1, kx2 = jax.random.split(key, 3)

    num_inputs, hidden, n_actions = 2, 64, 3
    params = init_params(kp, num_inputs, hidden, n_actions)
    prepared = prepare_params(params, n_actions)      # hoisted: once per update
    prepared = jax.block_until_ready(prepared)

    # --- small batch: single grid step ---------------------------------------
    batch = 8
    state = jax.random.normal(kx1, (batch, num_inputs), jnp.float32)
    logits, value = actor_critic_forward(state, *prepared, n_actions=n_actions)
    logits, value = jax.block_until_ready((logits, value))

    ref_logits, ref_value = reference_forward(state, params)
    assert logits.shape == (batch, n_actions)
    assert value.shape == (batch, 1)
    assert jnp.allclose(logits, ref_logits, atol=1e-4, rtol=1e-4)
    assert jnp.allclose(value, ref_value, atol=1e-4, rtol=1e-4)

    # --- large batch: grid=(2,) (one step per TensorCore on v7x) -------------
    big_batch, tile = 1024, 512
    state_big = jax.random.normal(kx2, (big_batch, num_inputs), jnp.float32)
    logits_b, value_b = actor_critic_forward(
        state_big, *prepared, n_actions=n_actions, batch_tile=tile)
    logits_b, value_b = jax.block_until_ready((logits_b, value_b))

    ref_lb, ref_vb = reference_forward(state_big, params)
    assert logits_b.shape == (big_batch, n_actions)
    assert value_b.shape == (big_batch, 1)
    assert jnp.allclose(logits_b, ref_lb, atol=1e-4, rtol=1e-4)
    assert jnp.allclose(value_b, ref_vb, atol=1e-4, rtol=1e-4)

    print("KERNEL_OK")
</pallas_src>

<mosaic_0001>
module attributes {stable_mosaic.version = 11 : i64} {
  func.func @actor_critic_kernel(%arg0: i32, %arg1: memref<2x8xf32, #tpu.memory_space<vmem>>, %arg2: memref<128x2xf32, #tpu.memory_space<vmem>>, %arg3: memref<128x1xf32, #tpu.memory_space<vmem>>, %arg4: memref<8x128xf32, #tpu.memory_space<vmem>>, %arg5: memref<8x1xf32, #tpu.memory_space<vmem>>, %arg6: memref<8x8xf32, #tpu.memory_space<vmem>>) attributes {dimension_semantics = [#tpu.dimension_semantics<parallel>], iteration_bounds = array<i64: 1>, scalar_prefetch = 0 : i64, scratch_operands = 0 : i64, tpu.core_type = #tpu.core_type<tc>, window_params = [{transform_indices = @transform_0, window_bounds = array<i64: 2, 8>}, {pipeline_mode = #tpu.pipeline_mode<synchronous>, transform_indices = @transform_1, window_bounds = array<i64: 128, 2>}, {pipeline_mode = #tpu.pipeline_mode<synchronous>, transform_indices = @transform_2, window_bounds = array<i64: 128, 1>}, {pipeline_mode = #tpu.pipeline_mode<synchronous>, transform_indices = @transform_3, window_bounds = array<i64: 8, 128>}, {pipeline_mode = #tpu.pipeline_mode<synchronous>, transform_indices = @transform_4, window_bounds = array<i64: 8, 1>}, {transform_indices = @transform_5, window_bounds = array<i64: 8, 8>}]} {
    %c0 = arith.constant 0 : index
    %c0_0 = arith.constant 0 : index
    %0 = vector.load %arg1[%c0, %c0_0] : memref<2x8xf32, #tpu.memory_space<vmem>>, vector<2x8xf32>
    %c0_1 = arith.constant 0 : index
    %c0_2 = arith.constant 0 : index
    %1 = vector.load %arg3[%c0_1, %c0_2] : memref<128x1xf32, #tpu.memory_space<vmem>>, vector<128x1xf32>
    %c0_3 = arith.constant 0 : index
    %c0_4 = arith.constant 0 : index
    %2 = vector.load %arg2[%c0_3, %c0_4] : memref<128x2xf32, #tpu.memory_space<vmem>>, vector<128x1xf32>
    %3 = vector.extract_strided_slice %0 {offsets = [0, 0], sizes = [1, 8], strides = [1, 1]} : vector<2x8xf32> to vector<1x8xf32>
    %4 = vector.broadcast %2 : vector<128x1xf32> to vector<128x8xf32>
    %5 = vector.broadcast %3 : vector<1x8xf32> to vector<128x8xf32>
    %6 = arith.mulf %4, %5 : vector<128x8xf32>
    %7 = vector.broadcast %1 : vector<128x1xf32> to vector<128x8xf32>
    %8 = arith.addf %7, %6 : vector<128x8xf32>
    %c0_5 = arith.constant 0 : index
    %c1 = arith.constant 1 : index
    %9 = vector.load %arg2[%c0_5, %c1] : memref<128x2xf32, #tpu.memory_space<vmem>>, vector<128x1xf32>
    %10 = vector.extract_strided_slice %0 {offsets = [1, 0], sizes = [1, 8], strides = [1, 1]} : vector<2x8xf32> to vector<1x8xf32>
    %11 = vector.broadcast %9 : vector<128x1xf32> to vector<128x8xf32>
    %12 = vector.broadcast %10 : vector<1x8xf32> to vector<128x8xf32>
    %13 = arith.mulf %11, %12 : vector<128x8xf32>
    %14 = arith.addf %8, %13 : vector<128x8xf32>
    %cst = arith.constant 0.000000e+00 : f32
    %15 = vector.broadcast %cst : f32 to vector<128x8xf32>
    %16 = arith.maximumf %14, %15 : vector<128x8xf32>
    %c0_6 = arith.constant 0 : index
    %c0_7 = arith.constant 0 : index
    %17 = vector.load %arg4[%c0_6, %c0_7] : memref<8x128xf32, #tpu.memory_space<vmem>>, vector<8x128xf32>
    %cst_8 = arith.constant dense<0.000000e+00> : vector<8x8xf32>
    %18 = tpu.matmul %17, %16, %cst_8 {dimension_numbers = #tpu.dot_dimension_numbers<[1], [0], [0], [1], [0, 0, 1, 1], [], []>} : vector<8x128xf32>, vector<128x8xf32>, vector<8x8xf32> -> vector<8x8xf32>
    %c0_9 = arith.constant 0 : index
    %c0_10 = arith.constant 0 : index
    %19 = vector.load %arg5[%c0_9, %c0_10] : memref<8x1xf32, #tpu.memory_space<vmem>>, vector<8x1xf32>
    %20 = vector.broadcast %19 : vector<8x1xf32> to vector<8x8xf32>
    %21 = arith.addf %18, %20 : vector<8x8xf32>
    %c0_11 = arith.constant 0 : index
    %c0_12 = arith.constant 0 : index
    %22 = vector.load %arg6[%c0_11, %c0_12] : memref<8x8xf32, #tpu.memory_space<vmem>>, vector<8x8xf32>
    tpu.vector_store %arg6[%c0_11, %c0_12], %21 {strides = array<i32>} : memref<8x8xf32, #tpu.memory_space<vmem>>, vector<8x8xf32>,
    return
  }
  func.func @transform_0(%arg0: i32) -> (i32, i32) {
    %c0_i32 = arith.constant 0 : i32
    %c0_i32_0 = arith.constant 0 : i32
    return %c0_i32, %arg0 : i32, i32
  }
  func.func @transform_1(%arg0: i32) -> (i32, i32) {
    %c0_i32 = arith.constant 0 : i32
    %c0_i32_0 = arith.constant 0 : i32
    %c0_i32_1 = arith.constant 0 : i32
    return %c0_i32, %c0_i32_0 : i32, i32
  }
  func.func @transform_2(%arg0: i32) -> (i32, i32) {
    %c0_i32 = arith.constant 0 : i32
    %c0_i32_0 = arith.constant 0 : i32
    %c0_i32_1 = arith.constant 0 : i32
    return %c0_i32, %c0_i32_0 : i32, i32
  }
  func.func @transform_3(%arg0: i32) -> (i32, i32) {
    %c0_i32 = arith.constant 0 : i32
    %c0_i32_0 = arith.constant 0 : i32
    %c0_i32_1 = arith.constant 0 : i32
    return %c0_i32, %c0_i32_0 : i32, i32
  }
  func.func @transform_4(%arg0: i32) -> (i32, i32) {
    %c0_i32 = arith.constant 0 : i32
    %c0_i32_0 = arith.constant 0 : i32
    %c0_i32_1 = arith.constant 0 : i32
    return %c0_i32, %c0_i32_0 : i32, i32
  }
  func.func @transform_5(%arg0: i32) -> (i32, i32) {
    %c0_i32 = arith.constant 0 : i32
    %c0_i32_0 = arith.constant 0 : i32
    return %c0_i32, %arg0 : i32, i32
  }
}

</mosaic_0001>

<bundles_post_ra>
// kernel: actor_critic_forward.1
= control target key start
LH: loop header
LB: loop body
LE: loop exit
PB: predicated region body
PF: predicated region fallthrough
CT: control target
= control target key end

     0   :  { %v549_v0 = vmov 0   ;;  %v550_v6 = vmov 1   ;;  %v551_v19 = vmov 0.0|0.0   ;;  %vm552_vm0 = vmmov 0   ;;  %s775_s2 = inlined_call_operand.vmem [shape: f32[128,1], index: 2, kind: input, shape index: {}]   ;;  %s776_s1 = inlined_call_operand.vmem [shape: f32[128,2], index: 1, kind: input, shape index: {}]   ;;  %s777_s4 = inlined_call_operand.vmem [shape: f32[8,1], index: 4, kind: input, shape index: {}]   ;;  %s778_s0 = inlined_call_operand.vmem [shape: f32[2,8], index: 0, kind: input, shape index: {}]   ;;  %s779_s3 = inlined_call_operand.vmem [shape: f32[8,128], index: 3, kind: input, shape index: {}]   ;;  %s780_s5 = inlined_call_operand.vmem [shape: f32[8,8], index: 5, kind: output, shape index: {}]  }
   0x1   :  { %530 = vset.pattern.permute.xlu1 %v549_v0  ;;  %529 = vset.pattern.permute.xlu0 %v549_v0  ;;  %v21_v1 = vld [vmem:[%s775_s2] sm:$0xff]  ;;  %v22_v3 = vld [vmem:[%s775_s2 + $0x8] sm:$0xff]  ;;  %v40_v5 = vld [vmem:[%s776_s1 + $0x18] sm:$0xff]  ;;  %v553_v44 = vmov 0.0   ;;  %v133_v45 = vlaneseq  ;;  %vm442_vm1 = vcmask 64512  }
   0x2   :  { %v37_v2 = vld [vmem:[%s776_s1] sm:$0xff]  ;;  %155 = vperm.xlu1 %530, %v21_v1   ;;  %v38_v4 = vld [vmem:[%s776_s1 + $0x8] sm:$0xff]  ;;  %v39_v8 = vld [vmem:[%s776_s1 + $0x10] sm:$0xff]  ;;  %500 = vmatprep.subr.bf16.mxu0 %v551_v19 }
   0x3   :  { %55 = vperm.xlu0 %529, %v37_v2   ;;  %v42_v7 = vld [vmem:[%s776_s1 + $0x28] sm:$0xff]  ;;  %v44_v9 = vld [vmem:[%s776_s1 + $0x38] sm:$0xff]  ;;  %v23_v10 = vld [vmem:[%s775_s2 + $0x10] sm:$0xff]  ;;  %497 = vmatprep.mubr.msk.f32.mxu0 %vm552_vm0, %v553_v44  ;;  %v134_v49 = vshrl.u32 %v133_v45, 7 }
   0x4   :  { %v46_v11 = vld [vmem:[%s776_s1 + $0x48] sm:$0xff]  ;;  %v24_v12 = vld [vmem:[%s775_s2 + $0x18] sm:$0xff]  ;;  %v41_v15 = vld [vmem:[%s776_s1 + $0x20] sm:$0xff] }
   0x5   :  { %v48_v13 = vld [vmem:[%s776_s1 + $0x58] sm:$0xff]  ;;  %v50_v14 = vld [vmem:[%s776_s1 + $0x68] sm:$0xff]  ;;  %v25_v17 = vld [vmem:[%s775_s2 + $0x20] sm:$0xff]  ;;  %v135_v52 = vsub.s32 0, %v134_v49  ;;  %v315_v53 = vsub.s32 1, %v134_v49 }
   0x6   :  { %160 = vperm.xlu1 %530, %v22_v3   ;;  %v634_v16 = vld [vmem:[%s776_s1 + $0x78] sm:$0xff]  ;;  %v26_v18 = vld [vmem:[%s775_s2 + $0x28] sm:$0xff]  ;;  %v43_v20 = vld [vmem:[%s776_s1 + $0x30] sm:$0xff] }
   0x7   :  { %60 = vperm.xlu0 %529, %v38_v4   ;;  %v27_v21 = vld [vmem:[%s775_s2 + $0x30] sm:$0xff]  ;;  %v45_v22 = vld [vmem:[%s776_s1 + $0x40] sm:$0xff]  ;;  %v28_v23 = vld [vmem:[%s775_s2 + $0x38] sm:$0xff] }
   0x8   :  { %v47_v24 = vld [vmem:[%s776_s1 + $0x50] sm:$0xff]  ;;  %v49_v25 = vld [vmem:[%s776_s1 + $0x60] sm:$0xff]  ;;  %v30_v28 = vld [vmem:[%s775_s2 + $0x48] sm:$0xff] }
   0x9   :  { %v51_v26 = vld [vmem:[%s776_s1 + $0x70] sm:$0xff]  ;;  %v29_v27 = vld [vmem:[%s775_s2 + $0x40] sm:$0xff]  ;;  %v32_v30 = vld [vmem:[%s775_s2 + $0x58] sm:$0xff] }
   0xa   :  { %531 = vset.pattern.permute.xlu1 %v550_v6  ;;  %v31_v29 = vld [vmem:[%s775_s2 + $0x50] sm:$0xff]  ;;  %v33_v31 = vld [vmem:[%s775_s2 + $0x60] sm:$0xff]  ;;  %v34_v32 = vld [vmem:[%s775_s2 + $0x68] sm:$0xff] }
   0xb   :  { %70 = vperm.xlu0 %529, %v40_v5   ;;  %254 = vperm.xlu1 %531, %v38_v4   ;;  %v35_v33 = vld [vmem:[%s775_s2 + $0x70] sm:$0xff]  ;;  %v36_v36 = vld [vmem:[%s775_s2 + $0x78] sm:$0xff]  ;;  %v366_v48 = vld [vmem:[%s777_s4] sm:$0xff] }
   0xc   :  { %v20_v54 = vld [vmem:[%s778_s0] sm:$0x3] }
   0xd   :  { %v719_v57 = vrot.slane %v20_v54, %v135_v52  ;;  %v721_v58 = vrot.slane %v20_v54, %v315_v53 }
   0xf   :  { %80 = vperm.xlu0 %529, %v42_v7   ;;  %532 = vset.pattern.permute.xlu1 %v549_v0 }
  0x10   :  { %65 = vperm.xlu1 %532, %v39_v8  }
  0x13   :  { %90 = vperm.xlu0 %529, %v44_v9  }
  0x14   :  { %165 = vperm.xlu1 %532, %v23_v10  }
  0x17   :  { %100 = vperm.xlu0 %529, %v46_v11  }
  0x18   :  { %170 = vperm.xlu1 %532, %v24_v12  }
  0x1b   :  { %110 = vperm.xlu0 %529, %v48_v13  }
  0x1c   :  { %533 = vset.pattern.permute.xlu1 %v550_v6 }
  0x1d   :  { %262 = vperm.xlu1 %533, %v40_v5  }
  0x1f   :  { %120 = vperm.xlu0 %529, %v50_v14  }
  0x21   :  { %534 = vset.pattern.permute.xlu1 %v549_v0 }
  0x22   :  { %75 = vperm.xlu1 %534, %v41_v15  }
  0x23   :  { %130 = vperm.xlu0 %529, %v634_v16  }
  0x26   :  { %175 = vperm.xlu1 %534, %v25_v17  }
  0x27   :  { %545 = vset.pattern.permute.xlu0 %v550_v6 }
  0x28   :  { %250 = vperm.xlu0 %545, %v37_v2  }
  0x2a   :  { %180 = vperm.xlu1 %534, %v26_v18  }
  0x2c   :  { %258 = vperm.xlu0 %545, %v39_v8  }
  0x2e   :  { %535 = vset.pattern.permute.xlu1 %v550_v6 }
  0x2f   :  { %270 = vperm.xlu1 %535, %v42_v7  }
  0x30   :  { %266 = vperm.xlu0 %545, %v41_v15  }
  0x33   :  { %536 = vset.pattern.permute.xlu1 %v549_v0 }
  0x34   :  { %274 = vperm.xlu0 %545, %v43_v20   ;;  %85 = vperm.xlu1 %536, %v43_v20  }
  0x38   :  { %282 = vperm.xlu0 %545, %v45_v22   ;;  %185 = vperm.xlu1 %536, %v27_v21  }
  0x3c   :  { %290 = vperm.xlu0 %545, %v47_v24   ;;  %190 = vperm.xlu1 %536, %v28_v23  }
  0x40   :  { %298 = vperm.xlu0 %545, %v49_v25   ;;  %537 = vset.pattern.permute.xlu1 %v550_v6 }
  0x41   :  { %278 = vperm.xlu1 %537, %v44_v9  }
  0x44   :  { %306 = vperm.xlu0 %545, %v51_v26  }
  0x45   :  { %538 = vset.pattern.permute.xlu1 %v549_v0 }
  0x46   :  { %95 = vperm.xlu1 %538, %v45_v22  }
  0x48   :  { %548 = vset.pattern.permute.xlu0 %v549_v0 }
  0x4a   :  { %195 = vperm.xlu1 %538, %v29_v27  }
  0x4e   :  { %200 = vperm.xlu1 %538, %v30_v28  }
  0x52   :  { %539 = vset.pattern.permute.xlu1 %v550_v6 }
  0x53   :  { %286 = vperm.xlu1 %539, %v46_v11  }
  0x57   :  { %540 = vset.pattern.permute.xlu1 %v549_v0 }
  0x58   :  { %105 = vperm.xlu1 %540, %v47_v24  }
  0x5c   :  { %205 = vperm.xlu1 %540, %v31_v29  }
  0x60   :  { %210 = vperm.xlu1 %540, %v32_v30  }
  0x64   :  { %541 = vset.pattern.permute.xlu1 %v550_v6 }
  0x65   :  { %294 = vperm.xlu1 %541, %v48_v13  }
  0x69   :  { %542 = vset.pattern.permute.xlu1 %v549_v0 }
  0x6a   :  { %115 = vperm.xlu1 %542, %v49_v25  }
  0x6e   :  { %215 = vperm.xlu1 %542, %v33_v31  }
  0x72   :  { %220 = vperm.xlu1 %542, %v34_v32  }
  0x76   :  { %543 = vset.pattern.permute.xlu1 %v550_v6 }
  0x77   :  { %302 = vperm.xlu1 %543, %v50_v14  }
  0x7b   :  { %544 = vset.pattern.permute.xlu1 %v549_v0 }
  0x7c   :  { %125 = vperm.xlu1 %544, %v51_v26  }
  0x80   :  { %225 = vperm.xlu1 %544, %v35_v33  }
  0x81   :  { %v156_v34 = vpop.permute.xlu1 %155 }
  0x82   :  { %v56_v35 = vpop.permute.xlu0 %55 }
  0x83   :  { %v137_v62 = vmul.f32 %v719_v57, %v56_v35 }
  0x84   :  { %230 = vperm.xlu1 %544, %v36_v36  }
  0x85   :  { %v161_v37 = vpop.permute.xlu1 %160  ;;  %v233_v5 = vadd.f32 %v156_v34, %v137_v62 }
  0x86   :  { %v61_v38 = vpop.permute.xlu0 %60 }
  0x87   :  { %v138_v59 = vmul.f32 %v719_v57, %v61_v38 }
  0x88   :  { %546 = vset.pattern.permute.xlu1 %v550_v6 }
  0x89   :  { %310 = vperm.xlu1 %546, %v634_v16   ;;  %v234_v1 = vadd.f32 %v161_v37, %v138_v59 }
  0x8a   :  { %v71_v39 = vpop.permute.xlu0 %70  ;;  %v255_v40 = vpop.permute.xlu1 %254 }
  0x8b   :  { %v318_v63 = vmul.f32 %v721_v58, %v255_v40 }
  0x8d   :  { %547 = vset.pattern.permute.xlu1 %v549_v0  ;;  %v140_v0 = vmul.f32 %v719_v57, %v71_v39  ;;  %v334_v6 = vadd.f32 %v318_v63, %v234_v1 }
  0x8e   :  { %v81_v41 = vpop.permute.xlu0 %80  ;;  %369 = vperm.xlu1 %547, %v366_v48  }
  0x8f   :  { %v66_v42 = vpop.permute.xlu1 %65  ;;  %v142_v12 = vmul.f32 %v719_v57, %v81_v41  ;;  %v350_v15 = vmax.f32 %v334_v6, 0.0 }
  0x90   :  { %v139_v9 = vmul.f32 %v719_v57, %v66_v42 }
  0x92   :  { %v705_v43 = vpop.permute.xlu0 %90 }
  0x93   :  { %v166_v46 = vpop.permute.xlu1 %165  ;;  %v144_v42 = vmul.f32 %v719_v57, %v705_v43 }
  0x94   :  { %v235_v16 = vadd.f32 %v166_v46, %v139_v9 }
  0x96   :  { %v707_v47 = vpop.permute.xlu0 %100 }
  0x97   :  { %v171_v50 = vpop.permute.xlu1 %170 }
  0x98   :  { %v236_v8 = vadd.f32 %v171_v50, %v140_v0 }
  0x9a   :  { %v712_v51 = vpop.permute.xlu0 %110 }
  0x9c   :  { %v263_v55 = vpop.permute.xlu1 %262 }
  0x9d   :  { %v320_v3 = vmul.f32 %v721_v58, %v263_v55 }
  0x9e   :  { %v717_v56 = vpop.permute.xlu0 %120 }
  0x9f   :  { %v336_v13 = vadd.f32 %v320_v3, %v236_v8 }
  0xa1   :  { %v76_v60 = vpop.permute.xlu1 %75  ;;  %v352_v23 = vmax.f32 %v336_v13, 0.0 }
  0xa2   :  { %v724_v61 = vpop.permute.xlu0 %130  ;;  %v141_v20 = vmul.f32 %v719_v57, %v76_v60 }
  0xa5   :  { %v176_v2 = vpop.permute.xlu1 %175 }
  0xa6   :  { %v237_v24 = vadd.f32 %v176_v2, %v141_v20  ;;  %v146_v2 = vmul.f32 %v719_v57, %v707_v47 }
  0xa7   :  { %v251_v4 = vpop.permute.xlu0 %250 }
  0xa8   :  { %v317_v7 = vmul.f32 %v721_v58, %v251_v4 }
  0xa9   :  { %v181_v11 = vpop.permute.xlu1 %180 }
  0xaa   :  { %v333_v10 = vadd.f32 %v317_v7, %v233_v5  ;;  %v238_v27 = vadd.f32 %v181_v11, %v142_v12 }
  0xab   :  { %v259_v14 = vpop.permute.xlu0 %258 }
  0xac   :  { %v349_v17 = vmax.f32 %v333_v10, 0.0  ;;  %v319_v18 = vmul.f32 %v721_v58, %v259_v14 }
  0xae   :  { %v335_v21 = vadd.f32 %v319_v18, %v235_v16  ;;  %v501_v22 = vpack.c.bf16 %v350_v15, %v349_v17  ;;  %v271_v25 = vpop.permute.xlu1 %270  ;;  %v148_v17 = vmul.f32 %v719_v57, %v712_v51 }
  0xaf   :  { %v267_v26 = vpop.permute.xlu0 %266  ;;  %v322_v29 = vmul.f32 %v721_v58, %v271_v25 }
  0xb0   :  { %v351_v28 = vmax.f32 %v335_v21, 0.0  ;;  %v321_v30 = vmul.f32 %v721_v58, %v267_v26  ;;  %502 = vmatpush3.bf16.msra.mxu0 %v501_v22 }
  0xb1   :  { %503 = vmatprep.subr.bf16.mxu0 %v551_v19  ;;  %v338_v31 = vadd.f32 %v322_v29, %v238_v27 }
  0xb2   :  { %v337_v32 = vadd.f32 %v321_v30, %v237_v24  ;;  %v504_v33 = vpack.c.bf16 %v352_v23, %v351_v28 }
  0xb3   :  { %v354_v34 = vmax.f32 %v338_v31, 0.0  ;;  %v86_v36 = vpop.permute.xlu1 %85  ;;  %v275_v39 = vpop.permute.xlu0 %274 }
  0xb4   :  { %v353_v35 = vmax.f32 %v337_v32, 0.0  ;;  %505 = vmatpush3.bf16.msra.mxu0 %v504_v33  ;;  %v143_v40 = vmul.f32 %v719_v57, %v86_v36  ;;  %v323_v45 = vmul.f32 %v721_v58, %v275_v39  ;;  %v150_v33 = vmul.f32 %v719_v57, %v717_v56 }
  0xb5   :  { %506 = vmatprep.subr.bf16.mxu0 %v551_v19  ;;  %v152_v56 = vmul.f32 %v719_v57, %v724_v61 }
  0xb6   :  { %v507_v37 = vpack.c.bf16 %v354_v34, %v353_v35 }
  0xb7   :  { %v186_v38 = vpop.permute.xlu1 %185  ;;  %v283_v62 = vpop.permute.xlu0 %282 }
  0xb8   :  { %508 = vmatpush3.bf16.msra.mxu0 %v507_v37  ;;  %v239_v44 = vadd.f32 %v186_v38, %v143_v40  ;;  %v325_v1 = vmul.f32 %v721_v58, %v283_v62 }
  0xb9   :  { %509 = vmatprep.subr.bf16.mxu0 %v551_v19 }
  0xba   :  { %v339_v48 = vadd.f32 %v323_v45, %v239_v44 }
  0xbb   :  { %v191_v41 = vpop.permute.xlu1 %190  ;;  %v291_v13 = vpop.permute.xlu0 %290 }
  0xbc   :  { %v240_v49 = vadd.f32 %v191_v41, %v144_v42  ;;  %v355_v53 = vmax.f32 %v339_v48, 0.0  ;;  %v327_v47 = vmul.f32 %v721_v58, %v291_v13 }
  0xbf   :  { %v299_v31 = vpop.permute.xlu0 %298 }
  0xc0   :  { %v279_v46 = vpop.permute.xlu1 %278  ;;  %v329_v51 = vmul.f32 %v721_v58, %v299_v31 }
  0xc1   :  { %v324_v50 = vmul.f32 %v721_v58, %v279_v46 }
  0xc3   :  { %v340_v52 = vadd.f32 %v324_v50, %v240_v49  ;;  %v307_v48 = vpop.permute.xlu0 %306 }
  0xc4   :  { %v331_v50 = vmul.f32 %v721_v58, %v307_v48 }
  0xc5   :  { %v356_v54 = vmax.f32 %v340_v52, 0.0  ;;  %v96_v55 = vpop.permute.xlu1 %95 }
  0xc6   :  { %v145_v43 = vmul.f32 %v719_v57, %v96_v55 }
  0xc7   :  { %v510_v59 = vpack.c.bf16 %v356_v54, %v355_v53 }
  0xc9   :  { %v196_v60 = vpop.permute.xlu1 %195  ;;  %511 = vmatpush3.bf16.msra.mxu0 %v510_v59 }
  0xca   :  { %512 = vmatprep.subr.bf16.mxu0 %v551_v19  ;;  %v241_v0 = vadd.f32 %v196_v60, %v145_v43 }
  0xcc   :  { %v341_v4 = vadd.f32 %v325_v1, %v241_v0 }
  0xcd   :  { %v201_v63 = vpop.permute.xlu1 %200 }
  0xce   :  { %v242_v5 = vadd.f32 %v201_v63, %v146_v2  ;;  %v357_v8 = vmax.f32 %v341_v4, 0.0 }
  0xd2   :  { %v287_v3 = vpop.permute.xlu1 %286 }
  0xd3   :  { %v326_v6 = vmul.f32 %v721_v58, %v287_v3 }
  0xd5   :  { %v342_v7 = vadd.f32 %v326_v6, %v242_v5 }
  0xd7   :  { %v358_v9 = vmax.f32 %v342_v7, 0.0  ;;  %v106_v10 = vpop.permute.xlu1 %105 }
  0xd8   :  { %v147_v14 = vmul.f32 %v719_v57, %v106_v10 }
  0xd9   :  { %v513_v11 = vpack.c.bf16 %v358_v9, %v357_v8 }
  0xdb   :  { %v206_v12 = vpop.permute.xlu1 %205  ;;  %514 = vmatpush3.bf16.msra.mxu0 %v513_v11 }
  0xdc   :  { %515 = vmatprep.subr.bf16.mxu0 %v551_v19  ;;  %v243_v16 = vadd.f32 %v206_v12, %v147_v14 }
  0xde   :  { %v343_v20 = vadd.f32 %v327_v47, %v243_v16 }
  0xdf   :  { %v211_v15 = vpop.permute.xlu1 %210 }
  0xe0   :  { %v244_v21 = vadd.f32 %v211_v15, %v148_v17  ;;  %v359_v24 = vmax.f32 %v343_v20, 0.0 }
  0xe4   :  { %v295_v18 = vpop.permute.xlu1 %294 }
  0xe5   :  { %v328_v22 = vmul.f32 %v721_v58, %v295_v18 }
  0xe7   :  { %v344_v23 = vadd.f32 %v328_v22, %v244_v21 }
  0xe9   :  { %v360_v25 = vmax.f32 %v344_v23, 0.0  ;;  %v116_v26 = vpop.permute.xlu1 %115 }
  0xea   :  { %v149_v29 = vmul.f32 %v719_v57, %v116_v26 }
  0xeb   :  { %v516_v27 = vpack.c.bf16 %v360_v25, %v359_v24 }
  0xed   :  { %v216_v28 = vpop.permute.xlu1 %215  ;;  %517 = vmatpush3.bf16.msra.mxu0 %v516_v27 }
  0xee   :  { %518 = vmatprep.subr.bf16.mxu0 %v551_v19  ;;  %v245_v32 = vadd.f32 %v216_v28, %v149_v29 }
  0xf0   :  { %v345_v35 = vadd.f32 %v329_v51, %v245_v32 }
  0xf1   :  { %v221_v30 = vpop.permute.xlu1 %220 }
  0xf2   :  { %v246_v36 = vadd.f32 %v221_v30, %v150_v33  ;;  %v361_v39 = vmax.f32 %v345_v35, 0.0 }
  0xf6   :  { %v303_v34 = vpop.permute.xlu1 %302 }
  0xf7   :  { %v330_v37 = vmul.f32 %v721_v58, %v303_v34 }
  0xf9   :  { %v346_v38 = vadd.f32 %v330_v37, %v246_v36 }
  0xfb   :  { %v362_v40 = vmax.f32 %v346_v38, 0.0  ;;  %v126_v41 = vpop.permute.xlu1 %125 }
  0xfc   :  { %v151_v45 = vmul.f32 %v719_v57, %v126_v41 }
  0xfd   :  { %v519_v42 = vpack.c.bf16 %v362_v40, %v361_v39 }
  0xff   :  { %v226_v44 = vpop.permute.xlu1 %225  ;;  %520 = vmatpush3.bf16.msra.mxu0 %v519_v42 }
 0x100   :  { %521 = vmatprep.subr.bf16.mxu0 %v551_v19  ;;  %v247_v49 = vadd.f32 %v226_v44, %v151_v45  ;;  %v365_v19 = vld [vmem:[%s779_s3] sm:$0xff] }
 0x102   :  { %v347_v53 = vadd.f32 %v331_v50, %v247_v49 }
 0x103   :  { %v231_v46 = vpop.permute.xlu1 %230 }
 0x104   :  { %v248_v54 = vadd.f32 %v231_v46, %v152_v56  ;;  %v363_v60 = vmax.f32 %v347_v53, 0.0 }
 0x108   :  { %v311_v52 = vpop.permute.xlu1 %310 }
 0x109   :  { %v332_v55 = vmul.f32 %v721_v58, %v311_v52 }
 0x10b   :  { %v348_v59 = vadd.f32 %v332_v55, %v248_v54 }
 0x10d   :  { %v364_v62 = vmax.f32 %v348_v59, 0.0  ;;  %v370_v63 = vpop.permute.xlu1 %369 }
 0x10f   :  { %v522_v43 = vpack.c.bf16 %v364_v62, %v363_v60 }
 0x111   :  { %523 = vmatpush3.bf16.msra.mxu0 %v522_v43 }
 0x114   :  { %498 = vmatmul.mubr.f32.vlgmr.msra.gmra.mrb[0].mxu0 %v365_v19 }
 0x1e7   :  { %v438_v0 = vpop.f32.mrb[0].mxu0 }
 0x1e8   :  { %v439_v57 = vadd.f32 %v438_v0, %v370_v63  ;;  %v499_v61 = vpop.f32.mrb[1].mxu0 }
 0x1ea   :  { %443 = vst.msk [vmem:[%s780_s5] sm:$0xff] %vm442_vm1, %v439_v57 }

</bundles_post_ra>
